<compile_context>
chip_gen: v7x
topology: tpu7x:2x2x1
jax: 0.10.0
libtpu: 0.0.40
codegen_flags: <defaults>
</compile_context>

<pallas_src>
import numpy as np
import jax
import jax.numpy as jnp
from jax.experimental import pallas as pl
from jax.experimental.pallas import tpu as pltpu

_TM = 512  # packed rows per tile along the lane axis (f32, multiple of 128)


def _pair_union_kernel(img_ref, box_ref, out_ref):
    # img_ref : (1, TM)  imgnum % batch_size, already float
    # box_ref : (8, TM)  rows 0-3 = box1 (x1,y1,x2,y2), rows 4-7 = box2
    # out_ref : (5, TM)  row 0 = batch col, rows 1-2 = min(x1,y1), 3-4 = max(x2,y2)
    b = box_ref[...]
    out_ref[0:1, :] = img_ref[...]
    out_ref[1:3, :] = jnp.minimum(b[0:2, :], b[4:6, :])
    out_ref[3:5, :] = jnp.maximum(b[2:4, :], b[6:8, :])


def _build_pair_tables(batch_size, obj_num):
    """Host-side: packed-row index tables (mirrors the .item()-driven loop)."""
    idx1, idx2, img = [], [], []
    begin = 0
    for imgnum, n in enumerate(int(v) for v in obj_num):
        if n >= 1:
            for k in range(n):                       # original boxes (pair k,k)
                idx1.append(begin + k)
                idx2.append(begin + k)
                img.append(imgnum % batch_size)
            for b1 in range(n):                      # union boxes, b1 < b2
                for b2 in range(b1 + 1, n):
                    idx1.append(begin + b1)
                    idx2.append(begin + b2)
                    img.append(imgnum % batch_size)
        begin += n
    return (np.asarray(idx1, dtype=np.int32),
            np.asarray(idx2, dtype=np.int32),
            np.asarray(img, dtype=np.float32))


def rois_pair_expanding(rois, batch_size, obj_num):
    """JAX/Pallas equivalent of _RoisPairExpandingLayer.forward.

    rois      : (R, 5) float array (col 0 = batch idx, cols 1:5 = x1,y1,x2,y2)
    batch_size: python int
    obj_num   : host-side sequence of per-image box counts (the PyTorch
                reference consumes it via .item(), i.e. it is host data).
    """
    rois = jnp.asarray(rois, dtype=jnp.float32)
    idx1, idx2, img = _build_pair_tables(batch_size, obj_num)
    m = int(idx1.shape[0])
    if m == 0:
        return jnp.zeros((0, 5), dtype=jnp.float32)

    m_pad = ((m + _TM - 1) // _TM) * _TM
    pad = m_pad - m
    idx1 = np.pad(idx1, (0, pad))                    # pad with valid index 0
    idx2 = np.pad(idx2, (0, pad))
    img = np.pad(img, (0, pad))

    coords = rois[:, 1:5].T                          # (4, R) coordinate-planar
    b1 = jnp.take(coords, jnp.asarray(idx1), axis=1)  # (4, m_pad)
    b2 = jnp.take(coords, jnp.asarray(idx2), axis=1)  # (4, m_pad)
    boxes = jnp.concatenate([b1, b2], axis=0)         # (8, m_pad)
    img_row = jnp.asarray(img)[None, :]               # (1, m_pad)

    out_planar = pl.pallas_call(
        _pair_union_kernel,
        out_shape=jax.ShapeDtypeStruct((5, m_pad), jnp.float32),
        grid=(m_pad // _TM,),
        in_specs=[
            pl.BlockSpec((1, _TM), lambda i: (0, i)),
            pl.BlockSpec((8, _TM), lambda i: (0, i)),
        ],
        out_specs=pl.BlockSpec((5, _TM), lambda i: (0, i)),
        compiler_params=pltpu.CompilerParams(
            dimension_semantics=("parallel",),
            vmem_limit_bytes=32 * 1024 * 1024,
        ),
    )(img_row, boxes)

    # Lane-dense kernel output -> row-major (M, 5); layout plumbing only.
    return out_planar.T[:m, :]


def _reference_numpy(rois, batch_size, obj_num):
    rois = np.asarray(rois, dtype=np.float32)
    out = []
    begin = 0
    for imgnum, n in enumerate(int(v) for v in obj_num):
        if n >= 1:
            cur = rois[begin:begin + n, 1:5]
            rows = [cur]
            for b1 in range(n):
                for b2 in range(b1 + 1, n):
                    tmin = np.minimum(cur[b1, 0:2], cur[b2, 0:2])
                    tmax = np.maximum(cur[b1, 2:4], cur[b2, 2:4])
                    rows.append(np.concatenate([tmin, tmax])[None, :])
            block = np.concatenate(rows, axis=0)
            col = np.full((block.shape[0], 1), imgnum % batch_size,
                          dtype=np.float32)
            out.append(np.concatenate([col, block], axis=1))
        begin += n
    if not out:
        return np.zeros((0, 5), dtype=np.float32)
    return np.concatenate(out, axis=0)


if __name__ == "__main__":
    key = jax.random.PRNGKey(0)
    batch_size = 2
    obj_num = [3, 1, 4, 2]                  # per-image box counts (host data)
    R = int(sum(obj_num))

    k1, k2 = jax.random.split(key)
    xy1 = jax.random.uniform(k1, (R, 2), minval=0.0, maxval=32.0,
                             dtype=jnp.float32)
    wh = jax.random.uniform(k2, (R, 2), minval=1.0, maxval=32.0,
                            dtype=jnp.float32)
    xy2 = xy1 + wh
    batch_col = jnp.zeros((R, 1), dtype=jnp.float32)
    rois = jnp.concatenate([batch_col, xy1, xy2], axis=1)   # (R, 5)

    out = rois_pair_expanding(rois, batch_size, obj_num)
    out = jax.block_until_ready(out)

    ref = _reference_numpy(np.asarray(rois), batch_size, obj_num)
    np.testing.assert_allclose(np.asarray(out), ref, rtol=1e-6, atol=1e-6)
    print("KERNEL_OK")
</pallas_src>

<mosaic_0001>
module attributes {stable_mosaic.version = 11 : i64} {
  func.func @_pair_union_kernel(%arg0: i32, %arg1: memref<1x512xf32, #tpu.memory_space<vmem>>, %arg2: memref<8x512xf32, #tpu.memory_space<vmem>>, %arg3: memref<5x512xf32, #tpu.memory_space<vmem>>) attributes {dimension_semantics = [#tpu.dimension_semantics<parallel>], iteration_bounds = array<i64: 1>, scalar_prefetch = 0 : i64, scratch_operands = 0 : i64, tpu.core_type = #tpu.core_type<tc>, window_params = [{transform_indices = @transform_0, window_bounds = array<i64: 1, 512>}, {transform_indices = @transform_1, window_bounds = array<i64: 8, 512>}, {transform_indices = @transform_2, window_bounds = array<i64: 5, 512>}]} {
    %c0 = arith.constant 0 : index
    %c0_0 = arith.constant 0 : index
    %0 = vector.load %arg2[%c0, %c0_0] : memref<8x512xf32, #tpu.memory_space<vmem>>, vector<8x512xf32>
    %c0_1 = arith.constant 0 : index
    %c0_2 = arith.constant 0 : index
    %1 = vector.load %arg1[%c0_1, %c0_2] : memref<1x512xf32, #tpu.memory_space<vmem>>, vector<1x512xf32>
    %c0_3 = arith.constant 0 : index
    %c0_4 = arith.constant 0 : index
    %2 = vector.load %arg3[%c0_3, %c0_4] : memref<5x512xf32, #tpu.memory_space<vmem>>, vector<1x512xf32>
    tpu.vector_store %arg3[%c0_3, %c0_4], %1 {strides = array<i32>} : memref<5x512xf32, #tpu.memory_space<vmem>>, vector<1x512xf32>,
    %3 = vector.extract_strided_slice %0 {offsets = [0, 0], sizes = [2, 512], strides = [1, 1]} : vector<8x512xf32> to vector<2x512xf32>
    %4 = vector.extract_strided_slice %0 {offsets = [4, 0], sizes = [2, 512], strides = [1, 1]} : vector<8x512xf32> to vector<2x512xf32>
    %5 = arith.minimumf %3, %4 : vector<2x512xf32>
    %c1 = arith.constant 1 : index
    %c0_5 = arith.constant 0 : index
    %6 = vector.load %arg3[%c1, %c0_5] : memref<5x512xf32, #tpu.memory_space<vmem>>, vector<2x512xf32>
    tpu.vector_store %arg3[%c1, %c0_5], %5 {strides = array<i32>} : memref<5x512xf32, #tpu.memory_space<vmem>>, vector<2x512xf32>,
    %7 = vector.extract_strided_slice %0 {offsets = [2, 0], sizes = [2, 512], strides = [1, 1]} : vector<8x512xf32> to vector<2x512xf32>
    %8 = vector.extract_strided_slice %0 {offsets = [6, 0], sizes = [2, 512], strides = [1, 1]} : vector<8x512xf32> to vector<2x512xf32>
    %9 = arith.maximumf %7, %8 : vector<2x512xf32>
    %c3 = arith.constant 3 : index
    %c0_6 = arith.constant 0 : index
    %10 = vector.load %arg3[%c3, %c0_6] : memref<5x512xf32, #tpu.memory_space<vmem>>, vector<2x512xf32>
    tpu.vector_store %arg3[%c3, %c0_6], %9 {strides = array<i32>} : memref<5x512xf32, #tpu.memory_space<vmem>>, vector<2x512xf32>,
    return
  }
  func.func @transform_0(%arg0: i32) -> (i32, i32) {
    %c0_i32 = arith.constant 0 : i32
    %c0_i32_0 = arith.constant 0 : i32
    return %c0_i32, %arg0 : i32, i32
  }
  func.func @transform_1(%arg0: i32) -> (i32, i32) {
    %c0_i32 = arith.constant 0 : i32
    %c0_i32_0 = arith.constant 0 : i32
    return %c0_i32, %arg0 : i32, i32
  }
  func.func @transform_2(%arg0: i32) -> (i32, i32) {
    %c0_i32 = arith.constant 0 : i32
    %c0_i32_0 = arith.constant 0 : i32
    return %c0_i32, %arg0 : i32, i32
  }
}

</mosaic_0001>

<bundles_post_ra>
// kernel: tpu_custom_call.1
= control target key start
LH: loop header
LB: loop body
LE: loop exit
PB: predicated region body
PF: predicated region fallthrough
CT: control target
= control target key end

     0   :  { %7 = vsyncpa [#allocation3], 0  ;;  %s244_s0 = inlined_call_operand.hbm [shape: f32[1,512], index: 0, kind: input, shape index: {}]   ;;  %s245_s1 = inlined_call_operand.hbm [shape: f32[8,512], index: 1, kind: input, shape index: {}]   ;;  %s246_s2 = inlined_call_operand.hbm [shape: f32[5,512], index: 2, kind: output, shape index: {}]  }
   0x1   :  { %8 = vsyncpa [#allocation6], 0 }
   0x2   :  { %9 = vsyncpa [#allocation4], 0  ;;  %s190_s9 = smov [#allocation2]   ;;  %s191_s11 = smov [#allocation5]  }
   0x3   :  { %s16_s10 = sshll.u32 %s190_s9, 4  ;;  %s26_s12 = sshll.u32 %s191_s11, 4  ;;  %s17_s10 = int_to_ptr.vmem [resolvable:$true] %s16_s10  ;;  %s27_s12 = int_to_ptr.vmem [resolvable:$true] %s26_s12 }
   0x4   :  { %s118_s15 = scalar_lea.hbm %s244_s0, 64 }
   0x5   :  { %p119_p0 = scmp.ne.s32.totalorder %s244_s0, %s118_s15  ;;  %p122_p1 = scmp.lt.u32.totalorder %s118_s15, %s244_s0 }
   0x7   :  { %p124_p2 = pnand %p122_p1, %p119_p0 }
   0x9   :  { %127 = shalt.err (!%p124_p2)
}
   0xa   :  { %s128_s20 = scalar_lea.vmem %s17_s10, 64  ;;  %p133_p4 = scmp.lt.s32.totalorder %s17_s10, %s17_s10 }
   0xb   :  { %p129_p3 = scmp.ne.s32.totalorder %s17_s10, %s128_s20  ;;  %p134_p5 = scmp.lt.s32.totalorder %s128_s20, %s128_s20 }
   0xd   :  { %p135_p6 = por %p134_p5, %p133_p4 }
   0xf   :  { %p136_p7 = pnand %p135_p6, %p129_p3 }
  0x11   :  { %139 = shalt.err (!%p136_p7)
}
  0x12   :  { %19 = dma.hbm_to_vmem [thread:$0]  %s244_s0, 64, %s17_s10, [#allocation3]  }
  0x13   :  { %s140_s25 = scalar_lea.hbm %s245_s1, 512 }
  0x14   :  { %p141_p8 = scmp.ne.s32.totalorder %s245_s1, %s140_s25  ;;  %p144_p9 = scmp.lt.u32.totalorder %s140_s25, %s245_s1 }
  0x16   :  { %p146_p10 = pnand %p144_p9, %p141_p8 }
  0x18   :  { %149 = shalt.err (!%p146_p10)
}
  0x19   :  { %s150_s30 = scalar_lea.vmem %s27_s12, 512  ;;  %p155_p12 = scmp.lt.s32.totalorder %s27_s12, %s27_s12 }
  0x1a   :  { %p151_p11 = scmp.ne.s32.totalorder %s27_s12, %s150_s30  ;;  %p156_p13 = scmp.lt.s32.totalorder %s150_s30, %s150_s30 }
  0x1c   :  { %p157_p0 = por %p156_p13, %p155_p12 }
  0x1e   :  { %p158_p1 = pnand %p157_p0, %p151_p11 }
  0x20   :  { %161 = shalt.err (!%p158_p1)
}
  0x21   :  { %29 = dma.hbm_to_vmem [thread:$0]  %s245_s1, 512, %s27_s12, [#allocation6]  }
  0x22   :  { %184 = dma.done.wait [#allocation3], 64  }
  0x23   :  { %185 = vsyncadd [#allocation3], 4294967232 }
  0x24   :  { %186 = dma.done.wait [#allocation6], 512  }
  0x25   :  { %187 = vsyncadd [#allocation6], 4294966784  ;;  %v41_v0 = vlaneseq  ;;  %v40_v1 = vld [vmem:[#allocation2] sm:$0xf]  ;;  %v36_v2 = vld [vmem:[#allocation5] sm:$0xff]  ;;  %s192_s1 = smov [#allocation7]  }
  0x26   :  { %v37_v3 = vld [vmem:[#allocation5 + $0x8] sm:$0xff]  ;;  %v51_v4 = vrot.slane %v36_v2, 4  ;;  %v38_v6 = vld [vmem:[#allocation5 + $0x10] sm:$0xff]  ;;  %v39_v7 = vld [vmem:[#allocation5 + $0x18] sm:$0xff]  ;;  %s105_s4 = sshll.u32 %s192_s1, 4  ;;  %s106_s4 = int_to_ptr.vmem [resolvable:$true] %s105_s4 }
  0x27   :  { %vm43_vm0 = vcmp.lt.s32.totalorder %v41_v0, 512  ;;  %v52_v5 = vrot.slane %v37_v3, 4  ;;  %v53_v8 = vrot.slane %v38_v6, 4  ;;  %v54_v9 = vrot.slane %v39_v7, 4  ;;  %s162_s5 = scalar_lea.vmem %s106_s4, 512  ;;  %p167_p3 = scmp.lt.s32.totalorder %s106_s4, %s106_s4 }
  0x28   :  { %45 = vst.msk [vmem:[#allocation7] ss:$8 sm:$0xf] %vm43_vm0, %v40_v1  ;;  %v59_v10 = vmin.f32 %v36_v2, %v51_v4  ;;  %v79_v12 = vmax.f32 %v36_v2, %v51_v4  ;;  %p163_p2 = scmp.ne.s32.totalorder %s106_s4, %s162_s5  ;;  %p168_p4 = scmp.lt.s32.totalorder %s162_s5, %s162_s5 }
  0x29   :  { %v60_v11 = vmin.f32 %v37_v3, %v52_v5  ;;  %v80_v13 = vmax.f32 %v37_v3, %v52_v5  ;;  %v61_v14 = vmin.f32 %v38_v6, %v53_v8  ;;  %v62_v15 = vmin.f32 %v39_v7, %v54_v9 }
  0x2a   :  { %v81_v16 = vmax.f32 %v38_v6, %v53_v8  ;;  %v82_v17 = vmax.f32 %v39_v7, %v54_v9  ;;  %v67_v18 = vrot.slane %v59_v10, 7  ;;  %v87_v20 = vrot.slane %v79_v12, 7  ;;  %p169_p5 = por %p168_p4, %p167_p3 }
  0x2b   :  { %v68_v19 = vrot.slane %v60_v11, 7  ;;  %v88_v21 = vrot.slane %v80_v13, 7  ;;  %v69_v22 = vrot.slane %v61_v14, 7  ;;  %v70_v23 = vrot.slane %v62_v15, 7 }
  0x2c   :  { %v89_v24 = vrot.slane %v81_v16, 7  ;;  %v90_v25 = vrot.slane %v82_v17, 7  ;;  %75 = vst [vmem:[#allocation7] sm:$0x6] %v67_v18  ;;  %95 = vst [vmem:[#allocation7] sm:$0x18] %v87_v20  ;;  %p170_p6 = pnand %p169_p5, %p163_p2 }
  0x2d   :  { %76 = vst [vmem:[#allocation7 + $0x8] sm:$0x6] %v68_v19  ;;  %96 = vst [vmem:[#allocation7 + $0x8] sm:$0x18] %v88_v21 }
  0x2e   :  { %77 = vst [vmem:[#allocation7 + $0x10] sm:$0x6] %v69_v22  ;;  %78 = vst [vmem:[#allocation7 + $0x18] sm:$0x6] %v70_v23 }
  0x2f   :  { %97 = vst [vmem:[#allocation7 + $0x10] sm:$0x18] %v89_v24  ;;  %98 = vst [vmem:[#allocation7 + $0x18] sm:$0x18] %v90_v25 }
  0x30   :  { %173 = shalt.err (!%p170_p6)
}
  0x31   :  { %s174_s8 = scalar_lea.hbm %s246_s2, 512 }
  0x32   :  { %p175_p7 = scmp.ne.s32.totalorder %s246_s2, %s174_s8  ;;  %p178_p8 = scmp.lt.u32.totalorder %s174_s8, %s246_s2 }
  0x34   :  { %p180_p9 = pnand %p178_p8, %p175_p7 }
  0x36   :  { %183 = shalt.err (!%p180_p9)
}
  0x37   :  { %108 = dma.vmem_to_hbm [thread:$0]  %s106_s4, 512, %s246_s2, [#allocation4]  }
  0x38   :  { %188 = dma.done.wait [#allocation4], 512  }
  0x39   :  { %189 = vsyncadd [#allocation4], 4294966784 }
  0x3a   :  { %112 = vsyncpa [#allocation3], 1 }
  0x3b   :  { %113 = vsyncpa [#allocation6], 1 }
  0x3c   :  { %114 = vsyncpa [#allocation4], 1 }

</bundles_post_ra>
